<compile_context>
chip_gen: v6e
topology: v6e:2x2x1
jax: 0.10.0
libtpu: 0.0.40
codegen_flags: <defaults>
</compile_context>

<pallas_src>
import math

import jax
import jax.numpy as jnp
from jax import lax
from jax.experimental import pallas as pl
from jax.experimental.pallas import tpu as pltpu


def _make_conv1d_kernel(TT, K, C_in, C_out):
    """Kernel body closed over static sizes. One haloed time tile per step."""

    def conv1d_kernel(xh_ref, w_ref, b_ref, o_ref):
        # xh_ref: (1, 1, C_in, TT + K - 1)  haloed time tile, NCL orientation
        # w_ref : (C_out, K * C_in)         folded weight slab
        # b_ref : (C_out, 1)                bias
        # o_ref : (1, C_out, TT)            output tile (lane axis = time)
        xw = xh_ref[0, 0]  # (C_in, TT + K - 1)

        # Build the im2col rhs once per tile: tap k contributes the window
        # shifted by k along the lane (time) axis. Row index = k * C_in + c,
        # matching the wrapper's weight repack.
        rhs = jnp.concatenate([xw[:, k:k + TT] for k in range(K)], axis=0)  # (K*C_in, TT)

        # Single MXU matmul with contraction depth K*C_in, f32 accumulation.
        acc = jnp.dot(w_ref[...], rhs, preferred_element_type=jnp.float32)  # (C_out, TT)

        o_ref[0] = (acc + b_ref[...].astype(jnp.float32)).astype(o_ref.dtype)

    return conv1d_kernel


def _pick_time_tile(T, max_tile):
    """Single tile for short sequences; else a multiple-of-128 tile."""
    if T <= max_tile:
        return T, 1
    TT = max_tile  # must be a multiple of 128 for lane-dense blocked stores
    nT = (T + TT - 1) // TT
    return TT, nT


def conv_norm_forward(x, weight, bias, *, time_tile=512):
    """ConvNorm forward.

    x      : (N, C_in, T)       -- PyTorch NCL layout
    weight : (C_out, C_in, K)   -- nn.Conv1d weight layout
    bias   : (C_out,)
    returns: (N, C_out, T)
    Semantics: stride=1, dilation=1, padding=(K-1)//2 ('same'), K odd.
    time_tile: time-tile size; 512 keeps the per-step footprint (double-buffered
    input+output+weight) within the default scoped-VMEM limit on v5e/v6e/v7x
    while staying near the HBM roofline.
    """
    # TODO(synk): stride > 1 and dilation > 1 not implemented (module defaults used).
    N, C_in, T = x.shape
    C_out, C_in_w, K = weight.shape
    assert C_in_w == C_in and K % 2 == 1
    pad = (K - 1) // 2

    TT, nT = _pick_time_tile(T, time_tile)
    T_round = TT * nT
    W = TT + K - 1  # tile + halo

    # --- wrapper glue (plain JAX, stays in NCL: no layout transposes) ---------
    # 'same' zero padding + right padding up to the tile boundary.
    x_pad = jnp.pad(x, ((0, 0), (0, 0), (pad, pad + (T_round - T))))  # (N, C_in, T_round+K-1)
    if nT == 1:
        xh = x_pad[:, None, :, :]                                     # (N, 1, C_in, W)
    else:
        # Gather each time tile together with its halo so BlockSpec tiling is
        # plain (non-overlapping). Extra HBM cost is only the (K-1)/TT halo.
        idx = (jnp.arange(nT) * TT)[:, None] + jnp.arange(W)[None, :]  # (nT, W)
        xh = jnp.moveaxis(jnp.take(x_pad, idx, axis=2), 2, 1)          # (N, nT, C_in, W)

    # Fold the K taps into the contraction: w2d[o, k*C_in + c] = weight[o, c, k].
    w2d = jnp.transpose(weight, (0, 2, 1)).reshape(C_out, K * C_in)
    b2d = bias.reshape(C_out, 1)

    kernel = _make_conv1d_kernel(TT, K, C_in, C_out)

    itemsize = jnp.dtype(x.dtype).itemsize
    cost = pl.CostEstimate(
        flops=2 * N * T_round * K * C_in * C_out,
        transcendentals=0,
        bytes_accessed=(N * T_round * (C_in + C_out) + K * C_in * C_out + C_out) * itemsize,
    )

    out = pl.pallas_call(
        kernel,
        out_shape=jax.ShapeDtypeStruct((N, C_out, T_round), x.dtype),
        grid_spec=pltpu.PrefetchScalarGridSpec(
            num_scalar_prefetch=0,
            grid=(N, nT),
            in_specs=[
                pl.BlockSpec((1, 1, C_in, W), lambda n, j: (n, j, 0, 0)),
                pl.BlockSpec((C_out, K * C_in), lambda n, j: (0, 0)),
                pl.BlockSpec((C_out, 1), lambda n, j: (0, 0)),
            ],
            out_specs=pl.BlockSpec((1, C_out, TT), lambda n, j: (n, 0, j)),
        ),
        compiler_params=pltpu.CompilerParams(
            dimension_semantics=("parallel", "parallel"),
        ),
        cost_estimate=cost,
    )(xh, w2d, b2d)

    if T_round != T:
        out = out[:, :, :T]
    return out


def init_conv_norm_params(key, in_channels, out_channels, kernel_size):
    """Parameter init mirroring ConvNorm.__init__ shapes/distributions.

    Weight ~ kaiming_normal_ (fan_in mode, gain=sqrt(2)); bias ~ Conv1d default
    U(-1/sqrt(fan_in), 1/sqrt(fan_in)). (Same distributions, not same RNG stream.)
    """
    kw, kb = jax.random.split(key)
    fan_in = in_channels * kernel_size
    std = math.sqrt(2.0) / math.sqrt(fan_in)
    weight = std * jax.random.normal(
        kw, (out_channels, in_channels, kernel_size), jnp.float32)
    bound = 1.0 / math.sqrt(fan_in)
    bias = jax.random.uniform(
        kb, (out_channels,), jnp.float32, minval=-bound, maxval=bound)
    return weight, bias


def _reference_conv1d(x, weight, bias):
    """Pure-JAX reference matching nn.Conv1d (stride=1, dilation=1, same pad)."""
    K = weight.shape[-1]
    pad = (K - 1) // 2
    out = lax.conv_general_dilated(
        x, weight,
        window_strides=(1,),
        padding=[(pad, pad)],
        dimension_numbers=("NCH", "OIH", "NCH"),
    )
    return out + bias[None, :, None]


if __name__ == "__main__":
    key = jax.random.PRNGKey(0)
    k_x, k_p, k_x2, k_p2 = jax.random.split(key, 4)

    # Test 1: tiny shapes (single time-tile path), matches the module defaults.
    N, C_in, C_out, T, K = 2, 4, 8, 16, 3
    x = jax.random.normal(k_x, (N, C_in, T), jnp.float32)
    weight, bias = init_conv_norm_params(k_p, C_in, C_out, K)

    out = jax.block_until_ready(conv_norm_forward(x, weight, bias))
    ref = _reference_conv1d(x, weight, bias)
    assert out.shape == (N, C_out, T)
    assert jnp.allclose(out, ref, atol=1e-5, rtol=1e-5), "Pallas conv mismatch (single-tile path)"

    # Test 2: exercise the time-tiled halo path (T not a multiple of the tile).
    N2, C_in2, C_out2, T2 = 2, 16, 32, 300
    x2 = jax.random.normal(k_x2, (N2, C_in2, T2), jnp.float32)
    w2, b2 = init_conv_norm_params(k_p2, C_in2, C_out2, K)

    out2 = jax.block_until_ready(conv_norm_forward(x2, w2, b2, time_tile=128))
    ref2 = _reference_conv1d(x2, w2, b2)
    assert out2.shape == (N2, C_out2, T2)
    assert jnp.allclose(out2, ref2, atol=1e-4, rtol=1e-4), "Pallas conv mismatch (tiled halo path)"

    print("KERNEL_OK")
</pallas_src>

<mosaic_0001>
module attributes {stable_mosaic.version = 11 : i64} {
  func.func @conv1d_kernel(%arg0: i32, %arg1: i32, %arg2: memref<1x1x4x18xf32, #tpu.memory_space<vmem>>, %arg3: memref<8x12xf32, #tpu.memory_space<vmem>>, %arg4: memref<8x1xf32, #tpu.memory_space<vmem>>, %arg5: memref<1x8x16xf32, #tpu.memory_space<vmem>>) attributes {dimension_semantics = [#tpu.dimension_semantics<parallel>, #tpu.dimension_semantics<parallel>], iteration_bounds = array<i64: 2, 1>, scalar_prefetch = 0 : i64, scratch_operands = 0 : i64, tpu.core_type = #tpu.core_type<tc>, window_params = [{transform_indices = @transform_0, window_bounds = array<i64: 1, 1, 4, 18>}, {pipeline_mode = #tpu.pipeline_mode<synchronous>, transform_indices = @transform_1, window_bounds = array<i64: 8, 12>}, {pipeline_mode = #tpu.pipeline_mode<synchronous>, transform_indices = @transform_2, window_bounds = array<i64: 8, 1>}, {transform_indices = @transform_3, window_bounds = array<i64: 1, 8, 16>}]} {
    %c0 = arith.constant 0 : index
    %c0_0 = arith.constant 0 : index
    %c0_1 = arith.constant 0 : index
    %c0_2 = arith.constant 0 : index
    %0 = vector.load %arg2[%c0, %c0_0, %c0_1, %c0_2] : memref<1x1x4x18xf32, #tpu.memory_space<vmem>>, vector<1x1x4x18xf32>
    %1 = vector.shape_cast %0 : vector<1x1x4x18xf32> to vector<4x18xf32>
    %2 = vector.extract_strided_slice %1 {offsets = [0, 0], sizes = [4, 16], strides = [1, 1]} : vector<4x18xf32> to vector<4x16xf32>
    %3 = vector.extract_strided_slice %1 {offsets = [0, 1], sizes = [4, 16], strides = [1, 1]} : vector<4x18xf32> to vector<4x16xf32>
    %4 = vector.extract_strided_slice %1 {offsets = [0, 2], sizes = [4, 16], strides = [1, 1]} : vector<4x18xf32> to vector<4x16xf32>
    %5 = tpu.concatenate %2, %3, %4 in 0 : vector<4x16xf32>, vector<4x16xf32>, vector<4x16xf32> -> vector<12x16xf32>
    %c0_3 = arith.constant 0 : index
    %c0_4 = arith.constant 0 : index
    %6 = vector.load %arg3[%c0_3, %c0_4] : memref<8x12xf32, #tpu.memory_space<vmem>>, vector<8x12xf32>
    %cst = arith.constant dense<0.000000e+00> : vector<8x16xf32>
    %7 = tpu.matmul %6, %5, %cst {dimension_numbers = #tpu.dot_dimension_numbers<[1], [0], [0], [1], [0, 0, 1, 1], [], []>} : vector<8x12xf32>, vector<12x16xf32>, vector<8x16xf32> -> vector<8x16xf32>
    %c0_5 = arith.constant 0 : index
    %c0_6 = arith.constant 0 : index
    %8 = vector.load %arg4[%c0_5, %c0_6] : memref<8x1xf32, #tpu.memory_space<vmem>>, vector<8x1xf32>
    %9 = vector.broadcast %8 : vector<8x1xf32> to vector<8x16xf32>
    %10 = arith.addf %7, %9 : vector<8x16xf32>
    %c0_7 = arith.constant 0 : index
    %c0_8 = arith.constant 0 : index
    %c0_9 = arith.constant 0 : index
    %11 = vector.load %arg5[%c0_7, %c0_8, %c0_9] : memref<1x8x16xf32, #tpu.memory_space<vmem>>, vector<1x8x16xf32>
    %12 = vector.shape_cast %11 : vector<1x8x16xf32> to vector<8x16xf32>
    %13 = vector.shape_cast %10 : vector<8x16xf32> to vector<1x8x16xf32>
    tpu.vector_store %arg5[%c0_7, %c0_8, %c0_9], %13 {strides = array<i32>} : memref<1x8x16xf32, #tpu.memory_space<vmem>>, vector<1x8x16xf32>,
    return
  }
  func.func @transform_0(%arg0: i32, %arg1: i32) -> (i32, i32, i32, i32) {
    %c0_i32 = arith.constant 0 : i32
    %c0_i32_0 = arith.constant 0 : i32
    %c0_i32_1 = arith.constant 0 : i32
    return %arg0, %arg1, %c0_i32, %c0_i32_0 : i32, i32, i32, i32
  }
  func.func @transform_1(%arg0: i32, %arg1: i32) -> (i32, i32) {
    %c0_i32 = arith.constant 0 : i32
    %c0_i32_0 = arith.constant 0 : i32
    %c0_i32_1 = arith.constant 0 : i32
    return %c0_i32, %c0_i32_0 : i32, i32
  }
  func.func @transform_2(%arg0: i32, %arg1: i32) -> (i32, i32) {
    %c0_i32 = arith.constant 0 : i32
    %c0_i32_0 = arith.constant 0 : i32
    %c0_i32_1 = arith.constant 0 : i32
    return %c0_i32, %c0_i32_0 : i32, i32
  }
  func.func @transform_3(%arg0: i32, %arg1: i32) -> (i32, i32, i32) {
    %c0_i32 = arith.constant 0 : i32
    %c0_i32_0 = arith.constant 0 : i32
    return %arg0, %c0_i32, %arg1 : i32, i32, i32
  }
}

</mosaic_0001>

<bundles_post_ra>
// kernel: tpu_custom_call.1
= control target key start
LH: loop header
LB: loop body
LE: loop exit
PB: predicated region body
PF: predicated region fallthrough
CT: control target
= control target key end

     0   :  { %8 = vsyncpa [#allocation3], 0  ;;  %s759_s0 = inlined_call_operand.vmem [shape: f32[2,1,4,18], index: 0, kind: input, shape index: {}]   ;;  %s760_s1 = inlined_call_operand.hbm [shape: f32[8,12], index: 1, kind: input, shape index: {}]   ;;  %s761_s2 = inlined_call_operand.vmem [shape: f32[8,1], index: 2, kind: input, shape index: {}]   ;;  %s762_s3 = inlined_call_operand.hbm [shape: f32[2,8,16], index: 3, kind: output, shape index: {}]  }
   0x1   :  { %9 = vsyncpa [#allocation4], 0 }
   0x2   :  { %11 = vsyncpa [#allocation4 + $0x1], 0  ;;  %s630_s12 = smov 0   ;;  %s632_s13 = smov 0  }
   0x3   :  { %s634_s14 = smov 0   ;;  %s636_s15 = smov 0  }
   0x4   :  { %s638_s16 = smov 0   ;;  %s640_s17 = smov 0  }
   0x5 LB: > { %s397_s18 = sadd.s32 4294967295, %s601_s17   ;;  %s398_s19 = sadd.s32 4294967294, %s601_s17   ;;  %s601_s17 = sphi %s640_s17, %s17_s17   ;;  %s597_s16 = sphi %s638_s16, %s771_s16   ;;  %s593_s15 = sphi %s636_s15, %s770_s15   ;;  %s589_s14 = sphi %s634_s14, %s769_s14   ;;  %s585_s13 = sphi %s632_s13, %s768_s13   ;;  %s581_s12 = sphi %s630_s12, %s767_s12  }
   0x6   : > { %s29_s20 = sadd.s32 1, %s597_s16  ;;  %s108_s21 = sadd.s32 1, %s589_s14 }
   0x7   : > { %p31_p0 = scmp.ge.s32.totalorder %s29_s20, 2  ;;  %p118_p1 = scmp.ne.s32.totalorder %s589_s14, %s585_s13 }
   0x8   : > { %p119_p2 = scmp.eq.s32.totalorder %s397_s18, 1  ;;  %p124_p3 = scmp.ne.s32.totalorder %s585_s13, %s581_s12 }
   0x9   : > { %s773_s20 = smov (%p31_p0, %s29_s20), 0  ;;  %p125_p5 = scmp.eq.s32.totalorder %s398_s19, 1 }
   0xa   : > { %p670_p4 = por %p119_p2, %p118_p1  ;;  %s103_s23 = ssub.s32 %s597_s16, %s773_s20 }
   0xb   : > { %p399_p6 = scmp.ge.s32.totalorder %s601_s17, 1  ;;  %p106_p7 = scmp.eq.s32.totalorder %s103_s23, 0 }
   0xc   : > { %p677_p8 = por %p125_p5, %p124_p3  ;;  %p132_p9 = scmp.lt.s32.totalorder %s601_s17, 3 }
   0xd   : > { %s683_s25 = scalar_select %p106_p7, %s589_s14, %s108_s21  }
   0xe   : > { %p685_p10 = pnand %p399_p6, %p132_p9  ;;  %p689_p11 = scmp.eq.s32.totalorder %s397_s18, 0 }
   0xf   : > { %s603_s28 = smov [#allocation2]  }
  0x10   : > { %p428_p12 = pneg %p685_p10  ;;  %s145_s29 = sshll.u32 %s603_s28, 4  ;;  %s146_s29 = int_to_ptr.vmem [resolvable:$true] %s145_s29 }
  0x11   : > { %s506_s30 = scalar_lea.vmem %s146_s29, 128  ;;  %p514_p5 = scmp.lt.s32.totalorder %s146_s29, %s146_s29 }
  0x12   : > { %p429_p13 = pnand %p689_p11, %p428_p12  ;;  %p507_p1 = scmp.ne.s32.totalorder %s146_s29, %s506_s30 }
  0x13   : > { %p515_p6 = scmp.lt.s32.totalorder %s506_s30, %s506_s30 }
  0x14   : > { %p497_p0 = pneg %p429_p13 }
  0x15   : > { %p516_p7 = por %p515_p6, %p514_p5 }
  0x16   : > { %p509_p2 = pnand %p507_p1, %p497_p0 }
  0x18   : > { %p510_p3 = pneg %p509_p2 }
  0x1a   : > { %p517_p9 = pnand %p516_p7, %p510_p3 }
  0x1c   : > { %520 = shalt.err (!%p517_p9)
}
  0x1d   : > { %431 = dma.hbm_to_vmem [thread:$0]  (!%p429_p13), %s760_s1, 128, %s146_s29, [#allocation3]  }
  0x1e   : > { %171 = sbr.rel (%p685_p10) target bundleno = 372 (0x174), region = 32 }
  0x23   : > { %572 = dma.done.wait (%p689_p11), [#allocation3], 128  }
  0x24   : > { %574 = vsyncadd (%p689_p11), [#allocation3], 4294967168  ;;  %p197_p12 = scmp.lt.s32.totalorder %s593_s15, 1  ;;  %v604_v0 = vmov 0.0   ;;  %vm605_vm0 = vmmov 0   ;;  %v606_v1 = vmov 0  }
  0x25   : > { %415 = vmatprep.subr.mxu0 %v604_v0  ;;  %419 = vmatprep.mubr.msk.f32.mxu0 %vm605_vm0, %v604_v0  ;;  %v215_v3 = vld [vmem:[%s761_s2] sm:$0xff]  ;;  %s607_s19 = smov 126   ;;  %s608_s21 = smov 127   ;;  %vm212_vm1 = vcmask 1043456   ;;  %vm221_vm2 = vcmask 97280   ;;  %vm297_vm3 = vcmask 130048  }
  0x26   : > { %s198_s6 = scalar_select %p197_p12, %s593_s15, 1  ;;  %493 = vset.pattern.permute.xlu1 %v606_v1  ;;  %494 = vset.pattern.permute.xlu0 %v606_v1  ;;  %v214_v7 = vld [vmem:[#allocation2] sm:$0xff] }
  0x27   : > { %218 = vperm.xlu1 %493, %v215_v3   ;;  %s194_s23 = sand.u32 1, %s585_s13   ;;  %s409_s27 = sshll.u32 %s593_s15, 7 }
  0x28   : > { %s405_s7 = sshll.u32 %s198_s6, 2  ;;  %s404_s26 = sshll.u32 %s194_s23, 3 }
  0x29   : > { %s203_s10 = scalar_lea.vmem %s759_s0, %s405_s7  ;;  %s196_s28 = scalar_lea.vmem [#allocation5], %s404_s26 }
  0x2a   : > { %v204_v2 = vld [vmem:[%s203_s10] sm:$0xf]  ;;  %s314_s29 = sshll.u32 %s196_s28, 4  ;;  %s719_s5 = scalar_lea.hbm %s762_s3, %s409_s27  ;;  %s315_s29 = int_to_ptr.vmem [resolvable:$true] %s314_s29 }
  0x2b   : > { %210 = vrot.lane.b32.xlu0 %v204_v2, %s607_s19  ;;  %v206_v4 = vrot.slane %v204_v2, 4  ;;  %s300_s6 = scalar_lea.sflag [#allocation4], %s194_s23  ;;  %s521_s7 = scalar_lea.vmem %s315_s29, 128 }
  0x2c   : > { %p522_p10 = scmp.ne.s32.totalorder %s315_s29, %s521_s7  ;;  %s609_s15 = smov [#allocation5]  }
  0x2d   : > { %s525_s8 = sshll.u32 %s609_s15, 4  ;;  %s526_s8 = int_to_ptr.vmem [resolvable:$false] %s525_s8 }
  0x2e   : > { %p523_p11 = pnand %p522_p10, %p670_p4  ;;  %s527_s9 = scalar_lea.vmem %s526_s8, 256 }
  0x2f   : > { %207 = vrot.lane.b32.xlu0 %v206_v4, %s608_s21  ;;  %p528_p0 = scmp.lt.s32.totalorder %s315_s29, %s526_s8  ;;  %p529_p1 = scmp.lt.s32.totalorder %s527_s9, %s521_s7 }
  0x30   : > { %p524_p13 = pneg %p523_p11 }
  0x31   : > { %p530_p2 = por %p529_p1, %p528_p0 }
  0x33   : > { %p531_p3 = pnand %p530_p2, %p524_p13 }
  0x9d   : > { %v211_v5 = vpop.permute.xlu0 %210 }
  0x9e   : > { %416 = vmatpush3.msk.msra.mxu0 %vm212_vm1, %v211_v5 }
  0x9f   : > { %417 = vmatprep.subr.mxu0 %v604_v0 }
  0xa1   : > { %v208_v6 = vpop.permute.xlu0 %207 }
  0xa2   : > { %v213_v8 = vsel %vm212_vm1, %v204_v2, %v208_v6  ;;  %v219_v9 = vpop.permute.xlu1 %218 }
  0xa3   : > { %418 = vmatpush3.msra.mxu0 %v213_v8 }
  0xa4   : > { %420 = vmatmul.mubr.msk.f32.vlgmr.msra.gmra.mxu0 %vm221_vm2, %v214_v7 }
 0x164   : > { %v293_v10 = vpop.f32.mrf.mxu0 }
 0x165   : > { %v294_v11 = vadd.f32 %v293_v10, %v219_v9 }
 0x166   : > { %v421_v12 = vpop.f32.mrf.mxu0 }
 0x167   : > { %298 = vst.msk [vmem:[%s196_s28] sm:$0xff] %vm297_vm3, %v294_v11 }
 0x168   : > { %534 = shalt.err (!%p531_p3)
}
 0x169   : > { %s535_s10 = scalar_lea.hbm %s719_s5, 128  ;;  %s539_s19 = scalar_lea.hbm %s762_s3, 256 }
 0x16a   : > { %p536_p5 = scmp.ne.s32.totalorder %s719_s5, %s535_s10  ;;  %p540_p9 = scmp.lt.s32.totalorder %s719_s5, %s762_s3 }
 0x16b   : > { %p541_p12 = scmp.lt.s32.totalorder %s539_s19, %s535_s10 }
 0x16c   : > { %p537_p6 = pnand %p536_p5, %p670_p4 }
 0x16d   : > { %p542_p10 = por %p541_p12, %p540_p9 }
 0x16e   : > { %p538_p7 = pneg %p537_p6 }
 0x170   : > { %p543_p11 = pnand %p542_p10, %p538_p7 }
 0x172   : > { %546 = shalt.err (!%p543_p11)
}
 0x173   : > { %426 = dma.vmem_to_hbm [thread:$0]  (%p670_p4), %s315_s29, 128, %s719_s5, %s300_s6  }
 0x174 PF: > { %p438_p13 = scmp.ge.s32.totalorder %s601_s17, 2  ;;  %s326_s26 = sand.u32 1, %s581_s12  }
 0x175   : > { %s327_s27 = scalar_lea.sflag [#allocation4], %s326_s26 }
 0x176   : > { %p433_p0 = pnand %p438_p13, %p677_p8 }
 0x178   : > { %p434_p1 = pneg %p433_p0 }
 0x17a   : > { %576 = dma.done.wait (%p434_p1), %s327_s27, 128  }
 0x17b   : > { %578 = vsyncadd (%p434_p1), %s327_s27, 4294967168  ;;  %s17_s17 = sadd.s32 1, %s601_s17   ;;  %s767_s12 = smov %s585_s13 }
 0x17c   : > { %p14_p2 = scmp.ge.s32.totalorder %s17_s17, 4   ;;  %s768_s13 = smov %s589_s14 }
 0x17d   : > { %s769_s14 = smov %s683_s25  ;;  %s770_s15 = smov %s597_s16 }
 0x17e   : > { %s771_s16 = smov %s773_s20  ;;  %16 = sbr.rel (!%p14_p2) target bundleno = 5 (0x5), region = 72 }
 0x183   :  { %332 = vsyncpa [#allocation3], 1 }
 0x184   :  { %334 = vsyncpa [#allocation3 + $0x1], 1 }
 0x185   :  { %335 = vsyncpa [#allocation4], 1 }
 0x186   :  { %337 = vsyncpa [#allocation4 + $0x1], 1 }

</bundles_post_ra>
